<compile_context>
chip_gen: v7x
topology: tpu7x:2x2x1
jax: 0.10.0
libtpu: 0.0.40
codegen_flags: <defaults>
</compile_context>

<pallas_src>
import functools

import jax
import jax.numpy as jnp
from jax.experimental import pallas as pl
from jax.experimental.pallas import tpu as pltpu

_LANE = 128
_SUBLANE = 8


def _round_up(n, m):
    return ((n + m - 1) // m) * m


def _vae_kernel(x_ref, eps_ref,
                w1_ref, b1_ref,
                w2_ref, b2_ref,
                w3_ref, b3_ref,
                w4_ref, b4_ref,
                recon_ref, mu_ref, logvar_ref,
                *, lat_p):
    x = x_ref[...]

    # encoder: Linear -> ReLU -> Linear (single fused mu|logvar head)
    h = jnp.dot(x, w1_ref[...], preferred_element_type=jnp.float32) + b1_ref[...]
    h = jnp.maximum(h, 0.0)
    h2 = jnp.dot(h, w2_ref[...], preferred_element_type=jnp.float32) + b2_ref[...]

    # split at a 128-aligned lane boundary (lat_p is a multiple of 128)
    mu = h2[:, :lat_p]
    logvar = h2[:, lat_p:]

    # reparameterize: z = mu + eps * exp(0.5 * logvar)
    z = mu + eps_ref[...] * jnp.exp(0.5 * logvar)

    # decoder: Linear -> ReLU -> Linear
    d = jnp.dot(z, w3_ref[...], preferred_element_type=jnp.float32) + b3_ref[...]
    d = jnp.maximum(d, 0.0)
    recon = jnp.dot(d, w4_ref[...], preferred_element_type=jnp.float32) + b4_ref[...]

    recon_ref[...] = recon.astype(recon_ref.dtype)
    mu_ref[...] = mu.astype(mu_ref.dtype)
    logvar_ref[...] = logvar.astype(logvar_ref.dtype)


def prepare_params(params, input_dim, hidden_dim, latent_dim):
    """One-time prep: transpose PyTorch (out,in) weights to (in,out), split the
    encoder head into a lane-padded mu|logvar slab, and zero-pad every feature
    dim up to a multiple of 128. Run this once, outside the hot path."""
    in_p = _round_up(input_dim, _LANE)
    hid_p = _round_up(hidden_dim, _LANE)
    lat_p = _round_up(latent_dim, _LANE)

    def pad2(a, rows, cols):
        a = jnp.asarray(a, jnp.float32)
        return jnp.zeros((rows, cols), jnp.float32).at[:a.shape[0], :a.shape[1]].set(a)

    w1 = pad2(params["enc_w1"].T, in_p, hid_p)
    b1 = pad2(params["enc_b1"].reshape(1, -1), 1, hid_p)

    # encoder head: (hid_p, 2*lat_p) slab; mu cols in [0, lat_p), logvar in [lat_p, 2*lat_p)
    w2t = params["enc_w2"].T                       # (hidden, 2*latent)
    b2v = params["enc_b2"].reshape(1, -1)
    w2 = jnp.zeros((hid_p, 2 * lat_p), jnp.float32)
    w2 = w2.at[:hidden_dim, :latent_dim].set(w2t[:, :latent_dim])
    w2 = w2.at[:hidden_dim, lat_p:lat_p + latent_dim].set(w2t[:, latent_dim:])
    b2 = jnp.zeros((1, 2 * lat_p), jnp.float32)
    b2 = b2.at[:, :latent_dim].set(b2v[:, :latent_dim])
    b2 = b2.at[:, lat_p:lat_p + latent_dim].set(b2v[:, latent_dim:])

    w3 = pad2(params["dec_w1"].T, lat_p, hid_p)
    b3 = pad2(params["dec_b1"].reshape(1, -1), 1, hid_p)
    w4 = pad2(params["dec_w2"].T, hid_p, in_p)
    b4 = pad2(params["dec_b2"].reshape(1, -1), 1, in_p)

    return dict(w1=w1, b1=b1, w2=w2, b2=b2, w3=w3, b3=b3, w4=w4, b4=b4)


@functools.partial(jax.jit, static_argnames=("input_dim", "latent_dim", "tile_b"))
def vae_forward(x, eps, prepped, *, input_dim, latent_dim, tile_b=1024):
    """x: (B, input_dim) f32, eps: (B, latent_dim) f32 standard-normal noise."""
    B = x.shape[0]
    w1, b1 = prepped["w1"], prepped["b1"]
    w2, b2 = prepped["w2"], prepped["b2"]
    w3, b3 = prepped["w3"], prepped["b3"]
    w4, b4 = prepped["w4"], prepped["b4"]
    in_p, hid_p = w1.shape
    lat_p = w3.shape[0]

    # Batch tile: large enough to fill the MXU / amortize per-step overhead,
    # capped so double-buffered I/O + resident weights fit the smallest default
    # scoped VMEM (16 MiB on v5e); safe on v6e/v7x as well.
    tb = _round_up(min(tile_b, _round_up(B, _SUBLANE)), _SUBLANE)
    b_pad = _round_up(B, tb)
    n_tiles = b_pad // tb

    # Zero-pad batch and feature dims (padded weight rows/cols are zero, so
    # padding contributes nothing to the real outputs).
    x_p = jnp.zeros((b_pad, in_p), jnp.float32).at[:B, :input_dim].set(x)
    eps_p = jnp.zeros((b_pad, lat_p), jnp.float32).at[:B, :latent_dim].set(eps)

    def act_spec(cols):          # streamed per batch-tile
        return pl.BlockSpec((tb, cols), lambda i: (i, 0))

    def res_spec(shape):         # VMEM-resident across all grid steps
        return pl.BlockSpec(shape, lambda i: (0, 0))

    recon, mu, logvar = pl.pallas_call(
        functools.partial(_vae_kernel, lat_p=lat_p),
        out_shape=(
            jax.ShapeDtypeStruct((b_pad, in_p), jnp.float32),
            jax.ShapeDtypeStruct((b_pad, lat_p), jnp.float32),
            jax.ShapeDtypeStruct((b_pad, lat_p), jnp.float32),
        ),
        grid=(n_tiles,),
        in_specs=[
            act_spec(in_p),              # x tile
            act_spec(lat_p),             # eps tile
            res_spec((in_p, hid_p)),     # w1
            res_spec((1, hid_p)),        # b1
            res_spec((hid_p, 2 * lat_p)),  # w2 (mu|logvar slab)
            res_spec((1, 2 * lat_p)),    # b2
            res_spec((lat_p, hid_p)),    # w3
            res_spec((1, hid_p)),        # b3
            res_spec((hid_p, in_p)),     # w4
            res_spec((1, in_p)),         # b4
        ],
        out_specs=(act_spec(in_p), act_spec(lat_p), act_spec(lat_p)),
        compiler_params=pltpu.CompilerParams(
            dimension_semantics=("parallel",)),
    )(x_p, eps_p, w1, b1, w2, b2, w3, b3, w4, b4)

    return (recon[:B, :input_dim],
            mu[:B, :latent_dim],
            logvar[:B, :latent_dim])


def init_params(key, input_dim, hidden_dim, latent_dim):
    """Deterministic synthetic init matching nn.Linear shapes (out, in)."""
    ks = jax.random.split(key, 8)

    def lin(kw, kb, out_d, in_d):
        bound = 1.0 / jnp.sqrt(jnp.float32(in_d))
        w = jax.random.uniform(kw, (out_d, in_d), jnp.float32, -bound, bound)
        b = jax.random.uniform(kb, (out_d,), jnp.float32, -bound, bound)
        return w, b

    enc_w1, enc_b1 = lin(ks[0], ks[1], hidden_dim, input_dim)
    enc_w2, enc_b2 = lin(ks[2], ks[3], latent_dim * 2, hidden_dim)
    dec_w1, dec_b1 = lin(ks[4], ks[5], hidden_dim, latent_dim)
    dec_w2, dec_b2 = lin(ks[6], ks[7], input_dim, hidden_dim)
    return dict(enc_w1=enc_w1, enc_b1=enc_b1, enc_w2=enc_w2, enc_b2=enc_b2,
                dec_w1=dec_w1, dec_b1=dec_b1, dec_w2=dec_w2, dec_b2=dec_b2)


def vae_forward_ref(x, eps, params, latent_dim):
    h = jnp.maximum(x @ params["enc_w1"].T + params["enc_b1"], 0.0)
    h2 = h @ params["enc_w2"].T + params["enc_b2"]
    mu, logvar = h2[:, :latent_dim], h2[:, latent_dim:]
    z = mu + eps * jnp.exp(0.5 * logvar)
    d = jnp.maximum(z @ params["dec_w1"].T + params["dec_b1"], 0.0)
    recon = d @ params["dec_w2"].T + params["dec_b2"]
    return recon, mu, logvar


if __name__ == "__main__":
    input_dim, hidden_dim, latent_dim = 32, 32, 16
    batch = 8

    key = jax.random.PRNGKey(0)
    k_x, k_eps, k_p = jax.random.split(key, 3)

    x = jax.random.normal(k_x, (batch, input_dim), jnp.float32)
    # eps corresponds to torch.randn_like(std): standard-normal noise.
    eps = jax.random.normal(k_eps, (batch, latent_dim), jnp.float32)
    params = init_params(k_p, input_dim, hidden_dim, latent_dim)

    # One-time weight prep (transpose / split / pad) — outside the hot path.
    prepped = prepare_params(params, input_dim, hidden_dim, latent_dim)

    recon, mu, logvar = vae_forward(x, eps, prepped,
                                    input_dim=input_dim, latent_dim=latent_dim)
    jax.block_until_ready((recon, mu, logvar))

    r_ref, mu_ref, lv_ref = vae_forward_ref(x, eps, params, latent_dim)
    assert jnp.allclose(recon, r_ref, atol=1e-4), "recon mismatch"
    assert jnp.allclose(mu, mu_ref, atol=1e-5), "mu mismatch"
    assert jnp.allclose(logvar, lv_ref, atol=1e-5), "logvar mismatch"

    print("KERNEL_OK")
</pallas_src>

<mosaic_0001>
module attributes {stable_mosaic.version = 11 : i64} {
  func.func @_vae_kernel(%arg0: i32, %arg1: memref<8x128xf32, #tpu.memory_space<vmem>>, %arg2: memref<8x128xf32, #tpu.memory_space<vmem>>, %arg3: memref<128x128xf32, #tpu.memory_space<vmem>>, %arg4: memref<1x128xf32, #tpu.memory_space<vmem>>, %arg5: memref<128x256xf32, #tpu.memory_space<vmem>>, %arg6: memref<1x256xf32, #tpu.memory_space<vmem>>, %arg7: memref<128x128xf32, #tpu.memory_space<vmem>>, %arg8: memref<1x128xf32, #tpu.memory_space<vmem>>, %arg9: memref<128x128xf32, #tpu.memory_space<vmem>>, %arg10: memref<1x128xf32, #tpu.memory_space<vmem>>, %arg11: memref<8x128xf32, #tpu.memory_space<vmem>>, %arg12: memref<8x128xf32, #tpu.memory_space<vmem>>, %arg13: memref<8x128xf32, #tpu.memory_space<vmem>>) attributes {dimension_semantics = [#tpu.dimension_semantics<parallel>], iteration_bounds = array<i64: 1>, scalar_prefetch = 0 : i64, scratch_operands = 0 : i64, tpu.core_type = #tpu.core_type<tc>, window_params = [{transform_indices = @transform_0, window_bounds = array<i64: 8, 128>}, {transform_indices = @transform_1, window_bounds = array<i64: 8, 128>}, {pipeline_mode = #tpu.pipeline_mode<synchronous>, transform_indices = @transform_2, window_bounds = array<i64: 128, 128>}, {pipeline_mode = #tpu.pipeline_mode<synchronous>, transform_indices = @transform_3, window_bounds = array<i64: 1, 128>}, {pipeline_mode = #tpu.pipeline_mode<synchronous>, transform_indices = @transform_4, window_bounds = array<i64: 128, 256>}, {pipeline_mode = #tpu.pipeline_mode<synchronous>, transform_indices = @transform_5, window_bounds = array<i64: 1, 256>}, {pipeline_mode = #tpu.pipeline_mode<synchronous>, transform_indices = @transform_6, window_bounds = array<i64: 128, 128>}, {pipeline_mode = #tpu.pipeline_mode<synchronous>, transform_indices = @transform_7, window_bounds = array<i64: 1, 128>}, {pipeline_mode = #tpu.pipeline_mode<synchronous>, transform_indices = @transform_8, window_bounds = array<i64: 128, 128>}, {pipeline_mode = #tpu.pipeline_mode<synchronous>, transform_indices = @transform_9, window_bounds = array<i64: 1, 128>}, {transform_indices = @transform_10, window_bounds = array<i64: 8, 128>}, {transform_indices = @transform_11, window_bounds = array<i64: 8, 128>}, {transform_indices = @transform_12, window_bounds = array<i64: 8, 128>}]} {
    %c0 = arith.constant 0 : index
    %c0_0 = arith.constant 0 : index
    %0 = vector.load %arg1[%c0, %c0_0] : memref<8x128xf32, #tpu.memory_space<vmem>>, vector<8x128xf32>
    %c0_1 = arith.constant 0 : index
    %c0_2 = arith.constant 0 : index
    %1 = vector.load %arg3[%c0_1, %c0_2] : memref<128x128xf32, #tpu.memory_space<vmem>>, vector<128x128xf32>
    %cst = arith.constant dense<0.000000e+00> : vector<8x128xf32>
    %2 = tpu.matmul %0, %1, %cst {dimension_numbers = #tpu.dot_dimension_numbers<[1], [0], [0], [1], [0, 0, 1, 1], [], []>} : vector<8x128xf32>, vector<128x128xf32>, vector<8x128xf32> -> vector<8x128xf32>
    %c0_3 = arith.constant 0 : index
    %c0_4 = arith.constant 0 : index
    %3 = vector.load %arg4[%c0_3, %c0_4] : memref<1x128xf32, #tpu.memory_space<vmem>>, vector<1x128xf32>
    %4 = vector.broadcast %3 : vector<1x128xf32> to vector<8x128xf32>
    %5 = arith.addf %2, %4 : vector<8x128xf32>
    %cst_5 = arith.constant 0.000000e+00 : f32
    %6 = vector.broadcast %cst_5 : f32 to vector<8x128xf32>
    %7 = arith.maximumf %5, %6 : vector<8x128xf32>
    %c0_6 = arith.constant 0 : index
    %c0_7 = arith.constant 0 : index
    %8 = vector.load %arg5[%c0_6, %c0_7] : memref<128x256xf32, #tpu.memory_space<vmem>>, vector<128x256xf32>
    %cst_8 = arith.constant dense<0.000000e+00> : vector<8x256xf32>
    %9 = tpu.matmul %7, %8, %cst_8 {dimension_numbers = #tpu.dot_dimension_numbers<[1], [0], [0], [1], [0, 0, 1, 1], [], []>} : vector<8x128xf32>, vector<128x256xf32>, vector<8x256xf32> -> vector<8x256xf32>
    %c0_9 = arith.constant 0 : index
    %c0_10 = arith.constant 0 : index
    %10 = vector.load %arg6[%c0_9, %c0_10] : memref<1x256xf32, #tpu.memory_space<vmem>>, vector<1x256xf32>
    %11 = vector.broadcast %10 : vector<1x256xf32> to vector<8x256xf32>
    %12 = arith.addf %9, %11 : vector<8x256xf32>
    %13 = vector.extract_strided_slice %12 {offsets = [0, 0], sizes = [8, 128], strides = [1, 1]} : vector<8x256xf32> to vector<8x128xf32>
    %14 = vector.extract_strided_slice %12 {offsets = [0, 128], sizes = [8, 128], strides = [1, 1]} : vector<8x256xf32> to vector<8x128xf32>
    %c0_11 = arith.constant 0 : index
    %c0_12 = arith.constant 0 : index
    %15 = vector.load %arg2[%c0_11, %c0_12] : memref<8x128xf32, #tpu.memory_space<vmem>>, vector<8x128xf32>
    %cst_13 = arith.constant 5.000000e-01 : f32
    %16 = vector.broadcast %cst_13 : f32 to vector<8x128xf32>
    %17 = arith.mulf %16, %14 : vector<8x128xf32>
    %18 = math.exp %17 : vector<8x128xf32>
    %19 = arith.mulf %15, %18 : vector<8x128xf32>
    %20 = arith.addf %13, %19 : vector<8x128xf32>
    %c0_14 = arith.constant 0 : index
    %c0_15 = arith.constant 0 : index
    %21 = vector.load %arg7[%c0_14, %c0_15] : memref<128x128xf32, #tpu.memory_space<vmem>>, vector<128x128xf32>
    %cst_16 = arith.constant dense<0.000000e+00> : vector<8x128xf32>
    %22 = tpu.matmul %20, %21, %cst_16 {dimension_numbers = #tpu.dot_dimension_numbers<[1], [0], [0], [1], [0, 0, 1, 1], [], []>} : vector<8x128xf32>, vector<128x128xf32>, vector<8x128xf32> -> vector<8x128xf32>
    %c0_17 = arith.constant 0 : index
    %c0_18 = arith.constant 0 : index
    %23 = vector.load %arg8[%c0_17, %c0_18] : memref<1x128xf32, #tpu.memory_space<vmem>>, vector<1x128xf32>
    %24 = vector.broadcast %23 : vector<1x128xf32> to vector<8x128xf32>
    %25 = arith.addf %22, %24 : vector<8x128xf32>
    %cst_19 = arith.constant 0.000000e+00 : f32
    %26 = vector.broadcast %cst_19 : f32 to vector<8x128xf32>
    %27 = arith.maximumf %25, %26 : vector<8x128xf32>
    %c0_20 = arith.constant 0 : index
    %c0_21 = arith.constant 0 : index
    %28 = vector.load %arg9[%c0_20, %c0_21] : memref<128x128xf32, #tpu.memory_space<vmem>>, vector<128x128xf32>
    %cst_22 = arith.constant dense<0.000000e+00> : vector<8x128xf32>
    %29 = tpu.matmul %27, %28, %cst_22 {dimension_numbers = #tpu.dot_dimension_numbers<[1], [0], [0], [1], [0, 0, 1, 1], [], []>} : vector<8x128xf32>, vector<128x128xf32>, vector<8x128xf32> -> vector<8x128xf32>
    %c0_23 = arith.constant 0 : index
    %c0_24 = arith.constant 0 : index
    %30 = vector.load %arg10[%c0_23, %c0_24] : memref<1x128xf32, #tpu.memory_space<vmem>>, vector<1x128xf32>
    %31 = vector.broadcast %30 : vector<1x128xf32> to vector<8x128xf32>
    %32 = arith.addf %29, %31 : vector<8x128xf32>
    %c0_25 = arith.constant 0 : index
    %c0_26 = arith.constant 0 : index
    %33 = vector.load %arg11[%c0_25, %c0_26] : memref<8x128xf32, #tpu.memory_space<vmem>>, vector<8x128xf32>
    tpu.vector_store %arg11[%c0_25, %c0_26], %32 {strides = array<i32>} : memref<8x128xf32, #tpu.memory_space<vmem>>, vector<8x128xf32>,
    %c0_27 = arith.constant 0 : index
    %c0_28 = arith.constant 0 : index
    %34 = vector.load %arg12[%c0_27, %c0_28] : memref<8x128xf32, #tpu.memory_space<vmem>>, vector<8x128xf32>
    tpu.vector_store %arg12[%c0_27, %c0_28], %13 {strides = array<i32>} : memref<8x128xf32, #tpu.memory_space<vmem>>, vector<8x128xf32>,
    %c0_29 = arith.constant 0 : index
    %c0_30 = arith.constant 0 : index
    %35 = vector.load %arg13[%c0_29, %c0_30] : memref<8x128xf32, #tpu.memory_space<vmem>>, vector<8x128xf32>
    tpu.vector_store %arg13[%c0_29, %c0_30], %14 {strides = array<i32>} : memref<8x128xf32, #tpu.memory_space<vmem>>, vector<8x128xf32>,
    return
  }
  func.func @transform_0(%arg0: i32) -> (i32, i32) {
    %c0_i32 = arith.constant 0 : i32
    %c0_i32_0 = arith.constant 0 : i32
    return %arg0, %c0_i32 : i32, i32
  }
  func.func @transform_1(%arg0: i32) -> (i32, i32) {
    %c0_i32 = arith.constant 0 : i32
    %c0_i32_0 = arith.constant 0 : i32
    return %arg0, %c0_i32 : i32, i32
  }
  func.func @transform_2(%arg0: i32) -> (i32, i32) {
    %c0_i32 = arith.constant 0 : i32
    %c0_i32_0 = arith.constant 0 : i32
    %c0_i32_1 = arith.constant 0 : i32
    return %c0_i32, %c0_i32_0 : i32, i32
  }
  func.func @transform_3(%arg0: i32) -> (i32, i32) {
    %c0_i32 = arith.constant 0 : i32
    %c0_i32_0 = arith.constant 0 : i32
    %c0_i32_1 = arith.constant 0 : i32
    return %c0_i32, %c0_i32_0 : i32, i32
  }
  func.func @transform_4(%arg0: i32) -> (i32, i32) {
    %c0_i32 = arith.constant 0 : i32
    %c0_i32_0 = arith.constant 0 : i32
    %c0_i32_1 = arith.constant 0 : i32
    return %c0_i32, %c0_i32_0 : i32, i32
  }
  func.func @transform_5(%arg0: i32) -> (i32, i32) {
    %c0_i32 = arith.constant 0 : i32
    %c0_i32_0 = arith.constant 0 : i32
    %c0_i32_1 = arith.constant 0 : i32
    return %c0_i32, %c0_i32_0 : i32, i32
  }
  func.func @transform_6(%arg0: i32) -> (i32, i32) {
    %c0_i32 = arith.constant 0 : i32
    %c0_i32_0 = arith.constant 0 : i32
    %c0_i32_1 = arith.constant 0 : i32
    return %c0_i32, %c0_i32_0 : i32, i32
  }
  func.func @transform_7(%arg0: i32) -> (i32, i32) {
    %c0_i32 = arith.constant 0 : i32
    %c0_i32_0 = arith.constant 0 : i32
    %c0_i32_1 = arith.constant 0 : i32
    return %c0_i32, %c0_i32_0 : i32, i32
  }
  func.func @transform_8(%arg0: i32) -> (i32, i32) {
    %c0_i32 = arith.constant 0 : i32
    %c0_i32_0 = arith.constant 0 : i32
    %c0_i32_1 = arith.constant 0 : i32
    return %c0_i32, %c0_i32_0 : i32, i32
  }
  func.func @transform_9(%arg0: i32) -> (i32, i32) {
    %c0_i32 = arith.constant 0 : i32
    %c0_i32_0 = arith.constant 0 : i32
    %c0_i32_1 = arith.constant 0 : i32
    return %c0_i32, %c0_i32_0 : i32, i32
  }
  func.func @transform_10(%arg0: i32) -> (i32, i32) {
    %c0_i32 = arith.constant 0 : i32
    %c0_i32_0 = arith.constant 0 : i32
    return %arg0, %c0_i32 : i32, i32
  }
  func.func @transform_11(%arg0: i32) -> (i32, i32) {
    %c0_i32 = arith.constant 0 : i32
    %c0_i32_0 = arith.constant 0 : i32
    return %arg0, %c0_i32 : i32, i32
  }
  func.func @transform_12(%arg0: i32) -> (i32, i32) {
    %c0_i32 = arith.constant 0 : i32
    %c0_i32_0 = arith.constant 0 : i32
    return %arg0, %c0_i32 : i32, i32
  }
}

</mosaic_0001>

<bundles_post_ra>
// kernel: vae_forward.1
= control target key start
LH: loop header
LB: loop body
LE: loop exit
PB: predicated region body
PF: predicated region fallthrough
CT: control target
= control target key end

     0   :  { %18 = vsyncpa [#allocation3], 0  ;;  %s1216_s0 = inlined_call_operand.vmem [shape: f32[8,128], index: 0, kind: input, shape index: {}]   ;;  %s1217_s1 = inlined_call_operand.vmem [shape: f32[8,128], index: 1, kind: input, shape index: {}]   ;;  %s1218_s2 = inlined_call_operand.hbm [shape: f32[128,128], index: 2, kind: input, shape index: {}]   ;;  %s1219_s3 = inlined_call_operand.vmem [shape: f32[1,128], index: 3, kind: input, shape index: {}]   ;;  %s1220_s4 = inlined_call_operand.hbm [shape: f32[128,256], index: 4, kind: input, shape index: {}]   ;;  %s1221_s5 = inlined_call_operand.vmem [shape: f32[1,256], index: 5, kind: input, shape index: {}]   ;;  %s1222_s6 = inlined_call_operand.hbm [shape: f32[128,128], index: 6, kind: input, shape index: {}]   ;;  %s1223_s7 = inlined_call_operand.vmem [shape: f32[1,128], index: 7, kind: input, shape index: {}]   ;;  %s1224_s8 = inlined_call_operand.hbm [shape: f32[128,128], index: 8, kind: input, shape index: {}]   ;;  %s1225_s9 = inlined_call_operand.vmem [shape: f32[1,128], index: 9, kind: input, shape index: {}]   ;;  %s1226_s10 = inlined_call_operand.hbm [shape: f32[8,128], index: 10, kind: output, shape index: {0}]   ;;  %s1227_s11 = inlined_call_operand.hbm [shape: f32[8,128], index: 11, kind: output, shape index: {1}]   ;;  %s1228_s12 = inlined_call_operand.hbm [shape: f32[8,128], index: 12, kind: output, shape index: {2}]  }
   0x1   :  { %19 = vsyncpa [#allocation6], 0 }
   0x2   :  { %20 = vsyncpa [#allocation9], 0 }
   0x3   :  { %21 = vsyncpa [#allocation4], 0 }
   0x4   :  { %22 = vsyncpa [#allocation12], 0  ;;  %s988_s21 = smov [#allocation5]   ;;  %s824_s25 = scalar_lea.hbm %s1220_s4, 4096 }
   0x5   :  { %s46_s22 = sshll.u32 %s988_s21, 4  ;;  %p825_p0 = scmp.ne.s32.totalorder %s1220_s4, %s824_s25  ;;  %s47_s22 = int_to_ptr.vmem [resolvable:$true] %s46_s22 }
   0x6   :  { %p828_p1 = scmp.lt.u32.totalorder %s824_s25, %s1220_s4 }
   0x8   :  { %p830_p2 = pnand %p828_p1, %p825_p0 }
   0xa   :  { %833 = shalt.err (!%p830_p2)
}
   0xb   :  { %s834_s30 = scalar_lea.vmem %s47_s22, 4096  ;;  %p839_p4 = scmp.lt.s32.totalorder %s47_s22, %s47_s22 }
   0xc   :  { %p835_p3 = scmp.ne.s32.totalorder %s47_s22, %s834_s30  ;;  %p840_p5 = scmp.lt.s32.totalorder %s834_s30, %s834_s30 }
   0xe   :  { %p841_p6 = por %p840_p5, %p839_p4 }
  0x10   :  { %p842_p7 = pnand %p841_p6, %p835_p3 }
  0x12   :  { %845 = shalt.err (!%p842_p7)
}
  0x13   :  { %s989_s13 = smov 256   ;;  %s990_s14 = smov 16  }
  0x14   :  { %52 = dma.hbm_to_vmem [thread:$0]  %s1220_s4, 4096, %s47_s22, [#allocation6], %s989_s13, %s989_s13, %s990_s14  }
  0x15   :  { %s991_s17 = smov [#allocation2]   ;;  %s846_s21 = scalar_lea.hbm %s1218_s2, 2048 }
  0x16   :  { %s32_s18 = sshll.u32 %s991_s17, 4  ;;  %p847_p8 = scmp.ne.s32.totalorder %s1218_s2, %s846_s21  ;;  %s33_s18 = int_to_ptr.vmem [resolvable:$true] %s32_s18 }
  0x17   :  { %p850_p9 = scmp.lt.u32.totalorder %s846_s21, %s1218_s2 }
  0x19   :  { %p852_p10 = pnand %p850_p9, %p847_p8 }
  0x1b   :  { %855 = shalt.err (!%p852_p10)
}
  0x1c   :  { %s856_s27 = scalar_lea.vmem %s33_s18, 2048  ;;  %p861_p12 = scmp.lt.s32.totalorder %s33_s18, %s33_s18 }
  0x1d   :  { %p857_p11 = scmp.ne.s32.totalorder %s33_s18, %s856_s27  ;;  %p862_p13 = scmp.lt.s32.totalorder %s856_s27, %s856_s27 }
  0x1f   :  { %p863_p0 = por %p862_p13, %p861_p12 }
  0x21   :  { %p864_p1 = pnand %p863_p0, %p857_p11 }
  0x23   :  { %867 = shalt.err (!%p864_p1)
}
  0x24   :  { %s992_s4 = smov 128   ;;  %s993_s22 = smov 8  }
  0x25   :  { %38 = dma.hbm_to_vmem [thread:$0]  %s1218_s2, 2048, %s33_s18, [#allocation3], %s992_s4, %s992_s4, %s993_s22  }
  0x26   :  { %s994_s30 = smov [#allocation7]   ;;  %s995_s14 = smov [#allocation8]  }
  0x27   :  { %s60_s13 = sshll.u32 %s994_s30, 4  ;;  %s74_s15 = sshll.u32 %s995_s14, 4  ;;  %s61_s13 = int_to_ptr.vmem [resolvable:$true] %s60_s13  ;;  %s1094_s15 = int_to_ptr.vmem [resolvable:$true] %s74_s15 }
  0x28   :  { %s868_s19 = scalar_lea.hbm %s1222_s6, 2048 }
  0x29   :  { %p869_p2 = scmp.ne.s32.totalorder %s1222_s6, %s868_s19  ;;  %p872_p3 = scmp.lt.u32.totalorder %s868_s19, %s1222_s6 }
  0x2b   :  { %p874_p4 = pnand %p872_p3, %p869_p2 }
  0x2d   :  { %877 = shalt.err (!%p874_p4)
}
  0x2e   :  { %s878_s2 = scalar_lea.vmem %s61_s13, 2048  ;;  %p883_p6 = scmp.lt.s32.totalorder %s61_s13, %s61_s13 }
  0x2f   :  { %p879_p5 = scmp.ne.s32.totalorder %s61_s13, %s878_s2  ;;  %p884_p7 = scmp.lt.s32.totalorder %s878_s2, %s878_s2 }
  0x31   :  { %p885_p8 = por %p884_p7, %p883_p6 }
  0x33   :  { %p886_p9 = pnand %p885_p8, %p879_p5 }
  0x35   :  { %889 = shalt.err (!%p886_p9)
}
  0x36   :  { %66 = dma.hbm_to_vmem [thread:$0]  %s1222_s6, 2048, %s61_s13, [#allocation6], %s992_s4, %s992_s4, %s993_s22  }
  0x37   :  { %s890_s28 = scalar_lea.hbm %s1224_s8, 2048 }
  0x38   :  { %p891_p10 = scmp.ne.s32.totalorder %s1224_s8, %s890_s28  ;;  %p894_p11 = scmp.lt.u32.totalorder %s890_s28, %s1224_s8 }
  0x3a   :  { %p896_p12 = pnand %p894_p11, %p891_p10 }
  0x3c   :  { %899 = shalt.err (!%p896_p12)
}
  0x3d   :  { %s900_s17 = scalar_lea.vmem %s1094_s15, 2048  ;;  %p905_p0 = scmp.lt.s32.totalorder %s1094_s15, %s1094_s15 }
  0x3e   :  { %p901_p13 = scmp.ne.s32.totalorder %s1094_s15, %s900_s17  ;;  %p906_p1 = scmp.lt.s32.totalorder %s900_s17, %s900_s17 }
  0x40   :  { %p907_p2 = por %p906_p1, %p905_p0 }
  0x42   :  { %p908_p3 = pnand %p907_p2, %p901_p13 }
  0x44   :  { %911 = shalt.err (!%p908_p3)
}
  0x45   :  { %80 = dma.hbm_to_vmem [thread:$0]  %s1224_s8, 2048, %s1094_s15, [#allocation9], %s992_s4, %s992_s4, %s993_s22  }
  0x46   :  { %978 = dma.done.wait [#allocation3], 2048  }
  0x47   :  { %979 = vsyncadd [#allocation3], 4294965248 }
  0x48   :  { %980 = dma.done.wait [#allocation6], 6144  }
  0x49   :  { %981 = vsyncadd [#allocation6], 4294961152 }
  0x4a   :  { %982 = dma.done.wait [#allocation9], 2048  }
  0x4b   :  { %983 = vsyncadd [#allocation9], 4294965248  ;;  %v996_v0 = vmov 0.0|0.0   ;;  %vm997_vm0 = vmmov 0   ;;  %v998_v1 = vmov 0.0   ;;  %v96_v2 = vld [vmem:[#allocation2] sm:$0xff] }
  0x4c   :  { %704 = vmatprep.subr.bf16.mxu0 %v996_v0  ;;  %631 = vmatprep.mubr.msk.f32.mxu0 %vm997_vm0, %v998_v1  ;;  %v97_v3 = vld [vmem:[#allocation2 + $0x8] sm:$0xff]  ;;  %v98_v4 = vld [vmem:[#allocation2 + $0x10] sm:$0xff]  ;;  %v99_v6 = vld [vmem:[#allocation2 + $0x18] sm:$0xff]  ;;  %s999_s23 = smov [#allocation11]  }
  0x4d   :  { %298 = vmatprep.mubr.f32.mxu1 %v998_v1  ;;  %v705_v5 = vpack.c.bf16 %v97_v3, %v96_v2  ;;  %v708_v7 = vpack.c.bf16 %v99_v6, %v98_v4  ;;  %v100_v8 = vld [vmem:[#allocation2 + $0x20] sm:$0xff]  ;;  %v101_v9 = vld [vmem:[#allocation2 + $0x28] sm:$0xff]  ;;  %v102_v11 = vld [vmem:[#allocation2 + $0x30] sm:$0xff]  ;;  %s517_s24 = sshll.u32 %s999_s23, 4  ;;  %s518_s24 = int_to_ptr.vmem [resolvable:$true] %s517_s24 }
  0x4e   :  { %v191_v10 = vld [vmem:[#allocation5 + $0x8] sm:$0xff]  ;;  %v103_v12 = vld [vmem:[#allocation2 + $0x38] sm:$0xff]  ;;  %v190_v14 = vld [vmem:[#allocation5] sm:$0xff]  ;;  %v711_v16 = vpack.c.bf16 %v101_v9, %v100_v8  ;;  %p917_p5 = scmp.lt.s32.totalorder %s518_s24, %s518_s24 }
  0x4f   :  { %706 = vmatpush3.bf16.msra.mxu0 %v705_v5  ;;  %v193_v13 = vld [vmem:[#allocation5 + $0x18] sm:$0xff]  ;;  %v192_v15 = vld [vmem:[#allocation5 + $0x10] sm:$0xff]  ;;  %v195_v19 = vld [vmem:[#allocation5 + $0x28] sm:$0xff]  ;;  %v714_v27 = vpack.c.bf16 %v103_v12, %v102_v11 }
  0x50   :  { %707 = vmatprep.subr.bf16.mxu0 %v996_v0  ;;  %v728_v17 = vpack.c.bf16 %v193_v13, %v191_v10  ;;  %v730_v18 = vpack.c.bf16 %v192_v15, %v190_v14  ;;  %v197_v20 = vld [vmem:[#allocation5 + $0x38] sm:$0xff]  ;;  %v194_v21 = vld [vmem:[#allocation5 + $0x20] sm:$0xff]  ;;  %v196_v23 = vld [vmem:[#allocation5 + $0x30] sm:$0xff] }
  0x51   :  { %v732_v22 = vpack.c.bf16 %v197_v20, %v195_v19  ;;  %v199_v24 = vld [vmem:[#allocation5 + $0x48] sm:$0xff]  ;;  %v201_v25 = vld [vmem:[#allocation5 + $0x58] sm:$0xff]  ;;  %v734_v26 = vpack.c.bf16 %v196_v23, %v194_v21  ;;  %v104_v28 = vld [vmem:[#allocation2 + $0x40] sm:$0xff] }
  0x52   :  { %729 = vmatprep.subr.bf16.mxu1 %v728_v17  ;;  %v736_v29 = vpack.c.bf16 %v201_v25, %v199_v24  ;;  %v198_v30 = vld [vmem:[#allocation5 + $0x40] sm:$0xff]  ;;  %v200_v31 = vld [vmem:[#allocation5 + $0x50] sm:$0xff]  ;;  %v105_v32 = vld [vmem:[#allocation2 + $0x48] sm:$0xff] }
  0x53   :  { %709 = vmatpush3.bf16.msra.mxu0 %v708_v7  ;;  %731 = vmatpush1.bf16.msra.mxu1 %v730_v18  ;;  %v203_v33 = vld [vmem:[#allocation5 + $0x68] sm:$0xff]  ;;  %v205_v34 = vld [vmem:[#allocation5 + $0x78] sm:$0xff]  ;;  %v738_v35 = vpack.c.bf16 %v200_v31, %v198_v30  ;;  %v717_v36 = vpack.c.bf16 %v105_v32, %v104_v28  ;;  %v106_v37 = vld [vmem:[#allocation2 + $0x50] sm:$0xff] }
  0x54   :  { %710 = vmatprep.subr.bf16.mxu0 %v996_v0  ;;  %733 = vmatprep.subr.bf16.mxu1 %v732_v22  ;;  %v740_v38 = vpack.c.bf16 %v205_v34, %v203_v33  ;;  %v202_v39 = vld [vmem:[#allocation5 + $0x60] sm:$0xff]  ;;  %v204_v40 = vld [vmem:[#allocation5 + $0x70] sm:$0xff]  ;;  %v107_v41 = vld [vmem:[#allocation2 + $0x58] sm:$0xff] }
  0x55   :  { %v207_v42 = vld [vmem:[#allocation5 + $0x88] sm:$0xff]  ;;  %v209_v43 = vld [vmem:[#allocation5 + $0x98] sm:$0xff]  ;;  %v742_v44 = vpack.c.bf16 %v204_v40, %v202_v39  ;;  %v720_v45 = vpack.c.bf16 %v107_v41, %v106_v37  ;;  %v108_v46 = vld [vmem:[#allocation2 + $0x60] sm:$0xff] }
  0x56   :  { %v744_v47 = vpack.c.bf16 %v209_v43, %v207_v42  ;;  %v206_v48 = vld [vmem:[#allocation5 + $0x80] sm:$0xff]  ;;  %v208_v49 = vld [vmem:[#allocation5 + $0x90] sm:$0xff]  ;;  %v109_v50 = vld [vmem:[#allocation2 + $0x68] sm:$0xff] }
  0x57   :  { %712 = vmatpush3.bf16.msra.mxu0 %v711_v16  ;;  %735 = vmatpush1.bf16.msra.mxu1 %v734_v26  ;;  %v211_v51 = vld [vmem:[#allocation5 + $0xa8] sm:$0xff]  ;;  %v213_v52 = vld [vmem:[#allocation5 + $0xb8] sm:$0xff]  ;;  %v746_v53 = vpack.c.bf16 %v208_v49, %v206_v48  ;;  %v723_v54 = vpack.c.bf16 %v109_v50, %v108_v46  ;;  %v110_v55 = vld [vmem:[#allocation2 + $0x70] sm:$0xff] }
  0x58   :  { %713 = vmatprep.subr.bf16.mxu0 %v996_v0  ;;  %737 = vmatprep.subr.bf16.mxu1 %v736_v29  ;;  %v748_v56 = vpack.c.bf16 %v213_v52, %v211_v51  ;;  %v210_v57 = vld [vmem:[#allocation5 + $0xa0] sm:$0xff]  ;;  %v212_v58 = vld [vmem:[#allocation5 + $0xb0] sm:$0xff]  ;;  %v111_v59 = vld [vmem:[#allocation2 + $0x78] sm:$0xff] }
  0x59   :  { %v215_v60 = vld [vmem:[#allocation5 + $0xc8] sm:$0xff]  ;;  %v217_v61 = vld [vmem:[#allocation5 + $0xd8] sm:$0xff]  ;;  %v750_v62 = vpack.c.bf16 %v212_v58, %v210_v57  ;;  %v726_v63 = vpack.c.bf16 %v111_v59, %v110_v55  ;;  %v214_v3 = vld [vmem:[#allocation5 + $0xc0] sm:$0xff] }
  0x5a   :  { %v752_v2 = vpack.c.bf16 %v217_v61, %v215_v60  ;;  %v216_v4 = vld [vmem:[#allocation5 + $0xd0] sm:$0xff]  ;;  %v95_v6 = vld [vmem:[%s1216_s0] sm:$0xff]  ;;  %v219_v7 = vld [vmem:[#allocation5 + $0xe8] sm:$0xff] }
  0x5b   :  { %715 = vmatpush3.bf16.msra.mxu0 %v714_v27  ;;  %739 = vmatpush1.bf16.msra.mxu1 %v738_v35  ;;  %v754_v5 = vpack.c.bf16 %v216_v4, %v214_v3  ;;  %v221_v8 = vld [vmem:[#allocation5 + $0xf8] sm:$0xff]  ;;  %v218_v10 = vld [vmem:[#allocation5 + $0xe0] sm:$0xff]  ;;  %v220_v11 = vld [vmem:[#allocation5 + $0xf0] sm:$0xff] }
  0x5c   :  { %716 = vmatprep.subr.bf16.mxu0 %v996_v0  ;;  %741 = vmatprep.subr.bf16.mxu1 %v740_v38  ;;  %v756_v9 = vpack.c.bf16 %v221_v8, %v219_v7  ;;  %v758_v12 = vpack.c.bf16 %v220_v11, %v218_v10  ;;  %v311_v13 = vld [vmem:[#allocation7] sm:$0xff]  ;;  %v312_v14 = vld [vmem:[#allocation7 + $0x8] sm:$0xff]  ;;  %v313_v15 = vld [vmem:[#allocation7 + $0x10] sm:$0xff] }
  0x5d   :  { %v761_v16 = vpack.c.bf16 %v312_v14, %v311_v13  ;;  %v314_v17 = vld [vmem:[#allocation7 + $0x18] sm:$0xff]  ;;  %v545_v19 = vld [vmem:[%s1219_s3] ss:$0 sm:$0xff]  ;;  %v316_v25 = vld [vmem:[#allocation7 + $0x28] sm:$0xff] }
  0x5e   :  { %v764_v18 = vpack.c.bf16 %v314_v17, %v313_v15  ;;  %v315_v24 = vld [vmem:[#allocation7 + $0x20] sm:$0xff]  ;;  %v317_v27 = vld [vmem:[#allocation7 + $0x30] sm:$0xff]  ;;  %v318_v28 = vld [vmem:[#allocation7 + $0x38] sm:$0xff] }
  0x5f   :  { %718 = vmatpush3.bf16.msra.mxu0 %v717_v36  ;;  %743 = vmatpush1.bf16.msra.mxu1 %v742_v44  ;;  %v767_v26 = vpack.c.bf16 %v316_v25, %v315_v24  ;;  %v770_v29 = vpack.c.bf16 %v318_v28, %v317_v27  ;;  %v319_v30 = vld [vmem:[#allocation7 + $0x40] sm:$0xff]  ;;  %v320_v31 = vld [vmem:[#allocation7 + $0x48] sm:$0xff]  ;;  %v321_v33 = vld [vmem:[#allocation7 + $0x50] sm:$0xff] }
  0x60   :  { %719 = vmatprep.subr.bf16.mxu0 %v996_v0  ;;  %745 = vmatprep.subr.bf16.mxu1 %v744_v47  ;;  %v773_v32 = vpack.c.bf16 %v320_v31, %v319_v30  ;;  %v322_v34 = vld [vmem:[#allocation7 + $0x58] sm:$0xff]  ;;  %v323_v35 = vld [vmem:[#allocation7 + $0x60] sm:$0xff]  ;;  %v324_v36 = vld [vmem:[#allocation7 + $0x68] sm:$0xff] }
  0x61   :  { %v779_v37 = vpack.c.bf16 %v324_v36, %v323_v35  ;;  %v325_v38 = vld [vmem:[#allocation7 + $0x70] sm:$0xff]  ;;  %v326_v39 = vld [vmem:[#allocation7 + $0x78] sm:$0xff]  ;;  %v405_v41 = vld [vmem:[#allocation8] sm:$0xff] }
  0x62   :  { %v782_v40 = vpack.c.bf16 %v326_v39, %v325_v38  ;;  %v406_v42 = vld [vmem:[#allocation8 + $0x8] sm:$0xff]  ;;  %v407_v43 = vld [vmem:[#allocation8 + $0x10] sm:$0xff]  ;;  %v409_v47 = vld [vmem:[#allocation8 + $0x20] sm:$0xff] }
  0x63   :  { %721 = vmatpush3.bf16.msra.mxu0 %v720_v45  ;;  %747 = vmatpush1.bf16.msra.mxu1 %v746_v53  ;;  %v785_v44 = vpack.c.bf16 %v406_v42, %v405_v41  ;;  %v408_v45 = vld [vmem:[#allocation8 + $0x18] sm:$0xff]  ;;  %v410_v48 = vld [vmem:[#allocation8 + $0x28] sm:$0xff]  ;;  %v411_v50 = vld [vmem:[#allocation8 + $0x30] sm:$0xff] }
  0x64   :  { %722 = vmatprep.subr.bf16.mxu0 %v996_v0  ;;  %749 = vmatprep.subr.bf16.mxu1 %v748_v56  ;;  %v788_v46 = vpack.c.bf16 %v408_v45, %v407_v43  ;;  %v791_v49 = vpack.c.bf16 %v410_v48, %v409_v47  ;;  %v412_v51 = vld [vmem:[#allocation8 + $0x38] sm:$0xff]  ;;  %v413_v53 = vld [vmem:[#allocation8 + $0x40] sm:$0xff]  ;;  %v415_v56 = vld [vmem:[#allocation8 + $0x50] sm:$0xff] }
  0x65   :  { %v794_v52 = vpack.c.bf16 %v412_v51, %v411_v50  ;;  %v416_v57 = vld [vmem:[#allocation8 + $0x58] sm:$0xff]  ;;  %v417_v59 = vld [vmem:[#allocation8 + $0x60] sm:$0xff]  ;;  %v418_v60 = vld [vmem:[#allocation8 + $0x68] sm:$0xff] }
  0x66   :  { %v800_v58 = vpack.c.bf16 %v416_v57, %v415_v56  ;;  %v803_v61 = vpack.c.bf16 %v418_v60, %v417_v59  ;;  %v222_v3 = vld [vmem:[%s1221_s5] sm:$0x3]  ;;  %v420_v17 = vld [vmem:[#allocation8 + $0x78] sm:$0xff] }
  0x67   :  { %724 = vmatpush3.bf16.msra.mxu0 %v723_v54  ;;  %751 = vmatpush1.bf16.msra.mxu1 %v750_v62  ;;  %v414_v54 = vld [vmem:[#allocation8 + $0x48] sm:$0xff]  ;;  %v224_v62 = vlaneseq }
  0x68   :  { %725 = vmatprep.subr.bf16.mxu0 %v996_v0  ;;  %753 = vmatprep.subr.bf16.mxu1 %v752_v2  ;;  %v797_v55 = vpack.c.bf16 %v414_v54, %v413_v53 }
  0x6b   :  { %727 = vmatpush3.bf16.msra.mxu0 %v726_v63  ;;  %755 = vmatpush1.bf16.msra.mxu1 %v754_v5  ;;  %v225_v63 = vshrl.u32 %v224_v62, 7 }
  0x6c   :  { %760 = vmatprep.subr.bf16.mxu0 %v996_v0  ;;  %757 = vmatprep.subr.bf16.mxu1 %v756_v9 }
  0x6d   :  { %v226_v2 = vsub.s32 0, %v225_v63  ;;  %v230_v4 = vsub.s32 1, %v225_v63 }
  0x6e   :  { %632 = vmatmul.mubr.f32.vlgmr.msra.gmra.mrb[0].mxu0 %v95_v6 }
  0x6f   :  { %666 = vmatprep.mubr.msk.f32.mxu0 %vm997_vm0, %v998_v1  ;;  %759 = vmatpush1.bf16.msra.mxu1 %v758_v12  ;;  %v227_v5 = vrot.slane %v222_v3, %v226_v2  ;;  %v231_v6 = vrot.slane %v222_v3, %v230_v4 }
  0x70   :  { %784 = vmatprep.subr.bf16.mxu1 %v996_v0  ;;  %762 = vmatpush3.bf16.msra.mxu0 %v761_v16  ;;  %v419_v16 = vld [vmem:[#allocation8 + $0x70] sm:$0xff] }
  0x71   :  { %763 = vmatprep.subr.bf16.mxu0 %v996_v0 }
  0x74   :  { %765 = vmatpush3.bf16.msra.mxu0 %v764_v18  ;;  %v806_v18 = vpack.c.bf16 %v420_v17, %v419_v16 }
  0x75   :  { %766 = vmatprep.subr.bf16.mxu0 %v996_v0 }
  0x78   :  { %768 = vmatpush3.bf16.msra.mxu0 %v767_v26 }
  0x79   :  { %769 = vmatprep.subr.bf16.mxu0 %v996_v0 }
  0x7c   :  { %771 = vmatpush3.bf16.msra.mxu0 %v770_v29 }
  0x7d   :  { %772 = vmatprep.subr.bf16.mxu0 %v996_v0 }
  0x80   :  { %774 = vmatpush3.bf16.msra.mxu0 %v773_v32 }
  0x81   :  { %775 = vmatprep.subr.bf16.mxu0 %v996_v0 }
 0x141   :  { %v185_v20 = vpop.f32.mrb[0].mxu0 }
 0x142   :  { %v186_v21 = vadd.f32 %v545_v19, %v185_v20  ;;  %v633_v22 = vpop.f32.mrb[1].mxu0  ;;  %v546_v19 = vld [vmem:[%s1223_s7] ss:$0 sm:$0xff] }
 0x144   :  { %v189_v23 = vmax.f32 %v186_v21, 0.0 }
 0x146   :  { %299 = vmatmul.mubr.f32.vlgmr.msra.gmra.mrb[0].mxu1 %v189_v23 }
 0x147   :  { %701 = vmatprep.mubr.msk.f32.mxu1 %vm997_vm0, %v998_v1  ;;  %v776_v1 = vpack.c.bf16 %v322_v34, %v321_v33  ;;  %786 = vmatpush3.bf16.msra.mxu1 %v785_v44 }
 0x148   :  { %787 = vmatprep.subr.bf16.mxu1 %v996_v0 }
 0x149   :  { %777 = vmatpush3.bf16.msra.mxu0 %v776_v1 }
 0x14a   :  { %778 = vmatprep.subr.bf16.mxu0 %v996_v0 }
 0x14b   :  { %789 = vmatpush3.bf16.msra.mxu1 %v788_v46 }
 0x14c   :  { %790 = vmatprep.subr.bf16.mxu1 %v996_v0 }
 0x14d   :  { %780 = vmatpush3.bf16.msra.mxu0 %v779_v37 }
 0x14e   :  { %781 = vmatprep.subr.bf16.mxu0 %v996_v0 }
 0x14f   :  { %792 = vmatpush3.bf16.msra.mxu1 %v791_v49 }
 0x150   :  { %793 = vmatprep.subr.bf16.mxu1 %v996_v0 }
 0x151   :  { %783 = vmatpush3.bf16.msra.mxu0 %v782_v40 }
 0x153   :  { %795 = vmatpush3.bf16.msra.mxu1 %v794_v52 }
 0x154   :  { %796 = vmatprep.subr.bf16.mxu1 %v996_v0 }
 0x157   :  { %798 = vmatpush3.bf16.msra.mxu1 %v797_v55 }
 0x158   :  { %799 = vmatprep.subr.bf16.mxu1 %v996_v0 }
 0x15b   :  { %801 = vmatpush3.bf16.msra.mxu1 %v800_v58 }
 0x15c   :  { %802 = vmatprep.subr.bf16.mxu1 %v996_v0 }
 0x15f   :  { %804 = vmatpush3.bf16.msra.mxu1 %v803_v61 }
 0x160   :  { %805 = vmatprep.subr.bf16.mxu1 %v996_v0  ;;  %v305_v0 = vld [vmem:[%s1217_s1] sm:$0xff]  ;;  %s912_s1 = scalar_lea.vmem %s518_s24, 128 }
 0x161   :  { %p913_p4 = scmp.ne.s32.totalorder %s518_s24, %s912_s1  ;;  %p918_p6 = scmp.lt.s32.totalorder %s912_s1, %s912_s1 }
 0x163   :  { %807 = vmatpush3.bf16.msra.mxu1 %v806_v18  ;;  %p919_p7 = por %p918_p6, %p917_p5 }
 0x165   :  { %p920_p8 = pnand %p919_p7, %p913_p4 }
 0x219   :  { %v300_v7 = vpop.f32.mrb[0].mxu1 }
 0x21a   :  { %v301_v8 = vadd.f32 %v300_v7, %v227_v5  ;;  %v302_v9 = vpop.f32.mrb[1].mxu1 }
 0x21b   :  { %v303_v10 = vadd.f32 %v302_v9, %v231_v6 }
 0x21c   :  { %499 = vst [vmem:[#allocation11] sm:$0xff] %v301_v8 }
 0x21d   :  { %v306_v11 = vmul.f32 0.5, %v303_v10  ;;  %500 = vst [vmem:[#allocation13] sm:$0xff] %v303_v10 }
 0x21f   :  { %v307_v12 = vmul.f32 1.442695, %v306_v11 }
 0x221   :  { %822 = vpow2.f32 %v307_v12 }
 0x22b   :  { %v823_v13 = vpop.eup %822 }
 0x22c   :  { %v309_v14 = vmul.f32 %v823_v13, %v305_v0 }
 0x22e   :  { %v310_v15 = vadd.f32 %v309_v14, %v301_v8 }
 0x230   :  { %667 = vmatmul.mubr.f32.vlgmr.msra.gmra.mrb[2].mxu0 %v310_v15 }
 0x303   :  { %v400_v20 = vpop.f32.mrb[2].mxu0 }
 0x304   :  { %v401_v21 = vadd.f32 %v546_v19, %v400_v20  ;;  %v668_v22 = vpop.f32.mrb[3].mxu0 }
 0x306   :  { %v404_v23 = vmax.f32 %v401_v21, 0.0 }
 0x308   :  { %702 = vmatmul.mubr.f32.vlgmr.msra.gmra.mrb[2].mxu1 %v404_v23 }
 0x309   :  { %923 = shalt.err (!%p920_p8)
}
 0x30a   :  { %s924_s25 = scalar_lea.hbm %s1227_s11, 128 }
 0x30b   :  { %p925_p9 = scmp.ne.s32.totalorder %s1227_s11, %s924_s25  ;;  %p928_p10 = scmp.lt.u32.totalorder %s924_s25, %s1227_s11 }
 0x30d   :  { %p930_p11 = pnand %p928_p10, %p925_p9 }
 0x30f   :  { %933 = shalt.err (!%p930_p11)
}
 0x310   :  { %520 = dma.vmem_to_hbm [thread:$0]  %s518_s24, 128, %s1227_s11, [#allocation12]  }
 0x311   :  { %s1000_s14 = smov [#allocation13]  }
 0x312   :  { %s527_s16 = sshll.u32 %s1000_s14, 4  ;;  %s528_s16 = int_to_ptr.vmem [resolvable:$true] %s527_s16 }
 0x313   :  { %s934_s17 = scalar_lea.vmem %s528_s16, 128  ;;  %p939_p13 = scmp.lt.s32.totalorder %s528_s16, %s528_s16 }
 0x314   :  { %p935_p12 = scmp.ne.s32.totalorder %s528_s16, %s934_s17  ;;  %p940_p0 = scmp.lt.s32.totalorder %s934_s17, %s934_s17 }
 0x316   :  { %p941_p1 = por %p940_p0, %p939_p13 }
 0x318   :  { %p942_p2 = pnand %p941_p1, %p935_p12 }
 0x31a   :  { %945 = shalt.err (!%p942_p2)
}
 0x31b   :  { %s946_s8 = scalar_lea.hbm %s1228_s12, 128 }
 0x31c   :  { %p947_p3 = scmp.ne.s32.totalorder %s1228_s12, %s946_s8  ;;  %p950_p4 = scmp.lt.u32.totalorder %s946_s8, %s1228_s12 }
 0x31e   :  { %p952_p5 = pnand %p950_p4, %p947_p3 }
 0x320   :  { %955 = shalt.err (!%p952_p5)
}
 0x321   :  { %530 = dma.vmem_to_hbm [thread:$0]  %s528_s16, 128, %s1228_s12, [#allocation12]   ;;  %v547_v24 = vld [vmem:[%s1225_s9] ss:$0 sm:$0xff] }
 0x322   :  { %s1001_s5 = smov [#allocation10]  }
 0x323   :  { %s507_s21 = sshll.u32 %s1001_s5, 4  ;;  %s508_s21 = int_to_ptr.vmem [resolvable:$true] %s507_s21 }
 0x324   :  { %s956_s23 = scalar_lea.vmem %s508_s21, 128  ;;  %p961_p7 = scmp.lt.s32.totalorder %s508_s21, %s508_s21 }
 0x325   :  { %p957_p6 = scmp.ne.s32.totalorder %s508_s21, %s956_s23  ;;  %p962_p8 = scmp.lt.s32.totalorder %s956_s23, %s956_s23 }
 0x327   :  { %p963_p9 = por %p962_p8, %p961_p7 }
 0x329   :  { %p964_p10 = pnand %p963_p9, %p957_p6 }
 0x3db   :  { %v494_v25 = vpop.f32.mrb[2].mxu1 }
 0x3dc   :  { %v495_v26 = vadd.f32 %v547_v24, %v494_v25  ;;  %v703_v27 = vpop.f32.mrb[3].mxu1 }
 0x3de   :  { %498 = vst [vmem:[#allocation10] sm:$0xff] %v495_v26 }
 0x3df   :  { %967 = shalt.err (!%p964_p10)
}
 0x3e0   :  { %s968_s1 = scalar_lea.hbm %s1226_s10, 128 }
 0x3e1   :  { %p969_p11 = scmp.ne.s32.totalorder %s1226_s10, %s968_s1  ;;  %p972_p12 = scmp.lt.u32.totalorder %s968_s1, %s1226_s10 }
 0x3e3   :  { %p974_p13 = pnand %p972_p12, %p969_p11 }
 0x3e5   :  { %977 = shalt.err (!%p974_p13)
}
 0x3e6   :  { %510 = dma.vmem_to_hbm [thread:$0]  %s508_s21, 128, %s1226_s10, [#allocation4]  }
 0x3e7   :  { %984 = dma.done.wait [#allocation4], 128  }
 0x3e8   :  { %985 = vsyncadd [#allocation4], 4294967168 }
 0x3e9   :  { %986 = dma.done.wait [#allocation12], 256  }
 0x3ea   :  { %987 = vsyncadd [#allocation12], 4294967040 }
 0x3eb   :  { %540 = vsyncpa [#allocation3], 1 }
 0x3ec   :  { %541 = vsyncpa [#allocation6], 1 }
 0x3ed   :  { %542 = vsyncpa [#allocation9], 1 }
 0x3ee   :  { %543 = vsyncpa [#allocation4], 1 }
 0x3ef   :  { %544 = vsyncpa [#allocation12], 1 }

</bundles_post_ra>
